<compile_context>
chip_gen: v6e
topology: v6e:2x2x1
jax: 0.10.0
libtpu: 0.0.40
codegen_flags: <defaults>
</compile_context>

<pallas_src>
import jax
import jax.numpy as jnp
from jax.experimental import pallas as pl
from jax.experimental.pallas import tpu as pltpu


def _round_up(x: int, m: int) -> int:
    return ((x + m - 1) // m) * m


def _make_mlp_kernel(num_linear_layers: int):
    """Build a fused MLP kernel for `num_linear_layers` Linear layers.

    Kernel ref order: (x_ref, w0, b0, w1, b1, ..., wN, bN, o_ref).
    ReLU is applied after every layer except the last (matches the module).
    Matmuls: bf16 operands, f32 accumulation; epilogue (bias+ReLU) in f32.
    """

    def kernel(x_ref, *refs):
        o_ref = refs[-1]
        wb_refs = refs[:-1]

        h = x_ref[...].astype(jnp.float32)
        for l in range(num_linear_layers):
            w = wb_refs[2 * l][...]          # (d_in, d_out), bf16
            b = wb_refs[2 * l + 1][...]      # (1, d_out), f32
            h = jnp.dot(h.astype(jnp.bfloat16), w,
                        preferred_element_type=jnp.float32) + b
            if l < num_linear_layers - 1:
                h = jnp.maximum(h, 0.0)      # ReLU on hidden layers only
        o_ref[...] = h.astype(o_ref.dtype)

    return kernel


def mlp_forward(x, weights, biases, *, input_dim: int, block_rows: int | None = None):
    """JAX/Pallas equivalent of MLP_customized.forward(x).

    Args:
      x:        any shape whose total size is a multiple of `input_dim`
                (the module does x.view(-1, input_dim)).
      weights:  list of (d_in, d_out) arrays, one per Linear layer.
      biases:   list of (d_out,) arrays, one per Linear layer.
      block_rows: batch-row tile; auto-picked if None (large tile, multiple of 8).
    """
    assert len(weights) == len(biases) and len(weights) >= 1

    xb = x.reshape(-1, input_dim)          # x.view(-1, input_dim)
    batch = xb.shape[0]
    out_dim = weights[-1].shape[1]
    dims = [input_dim] + [w.shape[1] for w in weights]
    max_dim = max(dims)

    # --- Batch tile: as large as reasonable (multiple of 8 for f32 sublanes),
    #     single grid step for small batches (demo: 16 rows -> grid=(1,)).
    if block_rows is None:
        block_rows = min(512, max(8, _round_up(batch, 8)))
    assert block_rows % 8 == 0, "block_rows must be a multiple of 8 (f32 sublanes)"
    grid_steps = pl.cdiv(batch, block_rows)   # no explicit padding; Pallas masks tail
    grid = (grid_steps,)

    in_specs = [pl.BlockSpec((block_rows, input_dim), lambda i: (i, 0))]
    args = [xb]
    weight_bytes = 0
    for w, b in zip(weights, biases):
        d_in, d_out = w.shape
        # Full-extent blocks with a constant index_map: loaded once, resident
        # in VMEM across all grid steps (no re-DMA per batch tile).
        in_specs.append(pl.BlockSpec((d_in, d_out), lambda i: (0, 0)))
        in_specs.append(pl.BlockSpec((1, d_out), lambda i: (0, 0)))
        args.append(w.astype(jnp.bfloat16))          # bf16 weights: 2x less DMA/VMEM
        args.append(b.reshape(1, d_out).astype(jnp.float32))
        weight_bytes += d_in * d_out * 2 + d_out * 4

    # --- Explicit VMEM budget (weights possibly double-buffered + double-buffered
    #     row tiles + live intermediates), with headroom.
    row_tile_bytes = 2 * block_rows * (input_dim + out_dim) * 4      # in/out, x2 buffers
    interm_bytes = 4 * block_rows * max_dim * 4                       # live activations slack
    vmem_needed = 2 * weight_bytes + row_tile_bytes + interm_bytes
    vmem_limit = int(min(100 * 1024 * 1024, max(32 * 1024 * 1024, 2 * vmem_needed)))

    # --- Only shard the grid across TensorCores when weight DMA is amortized
    #     over many batch tiles per core; tiny grids stay on one core.
    semantics = ("parallel",) if grid_steps >= 8 else ("arbitrary",)

    # --- Advisory cost estimate for XLA's scheduler.
    flops = 2 * batch * sum(din * dout for din, dout in zip(dims[:-1], dims[1:]))
    bytes_accessed = (xb.size * xb.dtype.itemsize
                      + weight_bytes
                      + batch * out_dim * x.dtype.itemsize)
    cost = pl.CostEstimate(flops=flops, transcendentals=0,
                           bytes_accessed=bytes_accessed)

    out = pl.pallas_call(
        _make_mlp_kernel(len(weights)),
        out_shape=jax.ShapeDtypeStruct((batch, out_dim), x.dtype),
        grid_spec=pl.GridSpec(
            grid=grid,
            in_specs=in_specs,
            out_specs=pl.BlockSpec((block_rows, out_dim), lambda i: (i, 0)),
        ),
        compiler_params=pltpu.CompilerParams(
            dimension_semantics=semantics,
            vmem_limit_bytes=vmem_limit,
        ),
        cost_estimate=cost,
    )(*args)

    return out[:batch]


def _mlp_reference(x, weights, biases, input_dim):
    """Pure-JAX f32 reference (mirrors the PyTorch forward)."""
    h = x.reshape(-1, input_dim).astype(jnp.float32)
    for l, (w, b) in enumerate(zip(weights, biases)):
        h = jnp.dot(h, w, preferred_element_type=jnp.float32) + b
        if l < len(weights) - 1:
            h = jnp.maximum(h, 0.0)
    return h


if __name__ == "__main__":
    # Module config: input_dim = 4*8*8 = 256, h_vec = [256, 128], output_dim = 128
    #   -> p_vec = [256, 256, 128, 128], i.e. 3 Linear layers, ReLU after the
    #      first two (L = 2 hidden layers + final projection).
    input_dim = 256
    h_vec = [256, 128]
    output_dim = 128
    p_vec = [input_dim] + h_vec + [output_dim]
    num_layers = len(p_vec) - 1

    key = jax.random.PRNGKey(0)
    keys = jax.random.split(key, 1 + 2 * num_layers)

    # Image-like input; forward flattens it to (-1, input_dim) = (16, 256).
    x = jax.random.normal(keys[0], (16, 4, 8, 8), dtype=jnp.float32)

    # nn.Linear-style init (uniform +/- 1/sqrt(fan_in)); weights stored (in, out).
    weights, biases = [], []
    for l in range(num_layers):
        bound = 1.0 / (p_vec[l] ** 0.5)
        w = jax.random.uniform(
            keys[1 + 2 * l], (p_vec[l], p_vec[l + 1]),
            minval=-bound, maxval=bound, dtype=jnp.float32)
        b = jax.random.uniform(
            keys[2 + 2 * l], (p_vec[l + 1],),
            minval=-bound, maxval=bound, dtype=jnp.float32)
        weights.append(w)
        biases.append(b)

    y = mlp_forward(x, weights, biases, input_dim=input_dim)
    y = jax.block_until_ready(y)

    ref = _mlp_reference(x, weights, biases, input_dim)
    assert y.shape == (16, output_dim), y.shape
    # Tolerance covers bf16-operand / f32-accumulate matmuls vs. the f32 reference.
    assert jnp.allclose(y, ref, atol=3e-2, rtol=3e-2), (
        "MLP kernel mismatch vs reference: "
        f"max abs err = {jnp.max(jnp.abs(y - ref))}"
    )

    print("KERNEL_OK")
</pallas_src>

<mosaic_0001>
module attributes {stable_mosaic.version = 11 : i64} {
  func.func @kernel(%arg0: i32, %arg1: memref<16x256xf32, #tpu.memory_space<vmem>>, %arg2: memref<256x256xbf16, #tpu.memory_space<vmem>>, %arg3: memref<1x256xf32, #tpu.memory_space<vmem>>, %arg4: memref<256x128xbf16, #tpu.memory_space<vmem>>, %arg5: memref<1x128xf32, #tpu.memory_space<vmem>>, %arg6: memref<128x128xbf16, #tpu.memory_space<vmem>>, %arg7: memref<1x128xf32, #tpu.memory_space<vmem>>, %arg8: memref<16x128xf32, #tpu.memory_space<vmem>>) attributes {dimension_semantics = [#tpu.dimension_semantics<arbitrary>], iteration_bounds = array<i64: 1>, scalar_prefetch = 0 : i64, scratch_operands = 0 : i64, tpu.core_type = #tpu.core_type<tc>, window_params = [{transform_indices = @transform_0, window_bounds = array<i64: 16, 256>}, {pipeline_mode = #tpu.pipeline_mode<synchronous>, transform_indices = @transform_1, window_bounds = array<i64: 256, 256>}, {pipeline_mode = #tpu.pipeline_mode<synchronous>, transform_indices = @transform_2, window_bounds = array<i64: 1, 256>}, {pipeline_mode = #tpu.pipeline_mode<synchronous>, transform_indices = @transform_3, window_bounds = array<i64: 256, 128>}, {pipeline_mode = #tpu.pipeline_mode<synchronous>, transform_indices = @transform_4, window_bounds = array<i64: 1, 128>}, {pipeline_mode = #tpu.pipeline_mode<synchronous>, transform_indices = @transform_5, window_bounds = array<i64: 128, 128>}, {pipeline_mode = #tpu.pipeline_mode<synchronous>, transform_indices = @transform_6, window_bounds = array<i64: 1, 128>}, {transform_indices = @transform_7, window_bounds = array<i64: 16, 128>}]} {
    %c0 = arith.constant 0 : index
    %c0_0 = arith.constant 0 : index
    %0 = vector.load %arg1[%c0, %c0_0] : memref<16x256xf32, #tpu.memory_space<vmem>>, vector<16x256xf32>
    %c0_1 = arith.constant 0 : index
    %c0_2 = arith.constant 0 : index
    %1 = vector.load %arg2[%c0_1, %c0_2] : memref<256x256xbf16, #tpu.memory_space<vmem>>, vector<256x256xbf16>
    %c0_3 = arith.constant 0 : index
    %c0_4 = arith.constant 0 : index
    %2 = vector.load %arg3[%c0_3, %c0_4] : memref<1x256xf32, #tpu.memory_space<vmem>>, vector<1x256xf32>
    %3 = arith.truncf %0 : vector<16x256xf32> to vector<16x256xbf16>
    %cst = arith.constant dense<0.000000e+00> : vector<16x256xf32>
    %4 = tpu.matmul %3, %1, %cst {dimension_numbers = #tpu.dot_dimension_numbers<[1], [0], [0], [1], [0, 0, 1, 1], [], []>} : vector<16x256xbf16>, vector<256x256xbf16>, vector<16x256xf32> -> vector<16x256xf32>
    %5 = vector.broadcast %2 : vector<1x256xf32> to vector<16x256xf32>
    %6 = arith.addf %4, %5 : vector<16x256xf32>
    %cst_5 = arith.constant 0.000000e+00 : f32
    %7 = vector.broadcast %cst_5 : f32 to vector<16x256xf32>
    %8 = arith.maximumf %6, %7 : vector<16x256xf32>
    %c0_6 = arith.constant 0 : index
    %c0_7 = arith.constant 0 : index
    %9 = vector.load %arg4[%c0_6, %c0_7] : memref<256x128xbf16, #tpu.memory_space<vmem>>, vector<256x128xbf16>
    %c0_8 = arith.constant 0 : index
    %c0_9 = arith.constant 0 : index
    %10 = vector.load %arg5[%c0_8, %c0_9] : memref<1x128xf32, #tpu.memory_space<vmem>>, vector<1x128xf32>
    %11 = arith.truncf %8 : vector<16x256xf32> to vector<16x256xbf16>
    %cst_10 = arith.constant dense<0.000000e+00> : vector<16x128xf32>
    %12 = tpu.matmul %11, %9, %cst_10 {dimension_numbers = #tpu.dot_dimension_numbers<[1], [0], [0], [1], [0, 0, 1, 1], [], []>} : vector<16x256xbf16>, vector<256x128xbf16>, vector<16x128xf32> -> vector<16x128xf32>
    %13 = vector.broadcast %10 : vector<1x128xf32> to vector<16x128xf32>
    %14 = arith.addf %12, %13 : vector<16x128xf32>
    %cst_11 = arith.constant 0.000000e+00 : f32
    %15 = vector.broadcast %cst_11 : f32 to vector<16x128xf32>
    %16 = arith.maximumf %14, %15 : vector<16x128xf32>
    %c0_12 = arith.constant 0 : index
    %c0_13 = arith.constant 0 : index
    %17 = vector.load %arg6[%c0_12, %c0_13] : memref<128x128xbf16, #tpu.memory_space<vmem>>, vector<128x128xbf16>
    %c0_14 = arith.constant 0 : index
    %c0_15 = arith.constant 0 : index
    %18 = vector.load %arg7[%c0_14, %c0_15] : memref<1x128xf32, #tpu.memory_space<vmem>>, vector<1x128xf32>
    %19 = arith.truncf %16 : vector<16x128xf32> to vector<16x128xbf16>
    %cst_16 = arith.constant dense<0.000000e+00> : vector<16x128xf32>
    %20 = tpu.matmul %19, %17, %cst_16 {dimension_numbers = #tpu.dot_dimension_numbers<[1], [0], [0], [1], [0, 0, 1, 1], [], []>} : vector<16x128xbf16>, vector<128x128xbf16>, vector<16x128xf32> -> vector<16x128xf32>
    %21 = vector.broadcast %18 : vector<1x128xf32> to vector<16x128xf32>
    %22 = arith.addf %20, %21 : vector<16x128xf32>
    %c0_17 = arith.constant 0 : index
    %c0_18 = arith.constant 0 : index
    %23 = vector.load %arg8[%c0_17, %c0_18] : memref<16x128xf32, #tpu.memory_space<vmem>>, vector<16x128xf32>
    tpu.vector_store %arg8[%c0_17, %c0_18], %22 {strides = array<i32>} : memref<16x128xf32, #tpu.memory_space<vmem>>, vector<16x128xf32>,
    return
  }
  func.func @transform_0(%arg0: i32) -> (i32, i32) {
    %c0_i32 = arith.constant 0 : i32
    %c0_i32_0 = arith.constant 0 : i32
    return %arg0, %c0_i32 : i32, i32
  }
  func.func @transform_1(%arg0: i32) -> (i32, i32) {
    %c0_i32 = arith.constant 0 : i32
    %c0_i32_0 = arith.constant 0 : i32
    %c0_i32_1 = arith.constant 0 : i32
    return %c0_i32, %c0_i32_0 : i32, i32
  }
  func.func @transform_2(%arg0: i32) -> (i32, i32) {
    %c0_i32 = arith.constant 0 : i32
    %c0_i32_0 = arith.constant 0 : i32
    %c0_i32_1 = arith.constant 0 : i32
    return %c0_i32, %c0_i32_0 : i32, i32
  }
  func.func @transform_3(%arg0: i32) -> (i32, i32) {
    %c0_i32 = arith.constant 0 : i32
    %c0_i32_0 = arith.constant 0 : i32
    %c0_i32_1 = arith.constant 0 : i32
    return %c0_i32, %c0_i32_0 : i32, i32
  }
  func.func @transform_4(%arg0: i32) -> (i32, i32) {
    %c0_i32 = arith.constant 0 : i32
    %c0_i32_0 = arith.constant 0 : i32
    %c0_i32_1 = arith.constant 0 : i32
    return %c0_i32, %c0_i32_0 : i32, i32
  }
  func.func @transform_5(%arg0: i32) -> (i32, i32) {
    %c0_i32 = arith.constant 0 : i32
    %c0_i32_0 = arith.constant 0 : i32
    %c0_i32_1 = arith.constant 0 : i32
    return %c0_i32, %c0_i32_0 : i32, i32
  }
  func.func @transform_6(%arg0: i32) -> (i32, i32) {
    %c0_i32 = arith.constant 0 : i32
    %c0_i32_0 = arith.constant 0 : i32
    %c0_i32_1 = arith.constant 0 : i32
    return %c0_i32, %c0_i32_0 : i32, i32
  }
  func.func @transform_7(%arg0: i32) -> (i32, i32) {
    %c0_i32 = arith.constant 0 : i32
    %c0_i32_0 = arith.constant 0 : i32
    return %arg0, %c0_i32 : i32, i32
  }
}

</mosaic_0001>

<bundles_post_ra>
// kernel: tpu_custom_call.1
= control target key start
LH: loop header
LB: loop body
LE: loop exit
PB: predicated region body
PF: predicated region fallthrough
CT: control target
= control target key end

     0   :  { %12 = vsyncpa [#allocation3], 0  ;;  %s1039_s0 = inlined_call_operand.hbm [shape: f32[16,256], index: 0, kind: input, shape index: {}]   ;;  %s1040_s1 = inlined_call_operand.hbm [shape: bf16[256,256], index: 1, kind: input, shape index: {}]   ;;  %s1041_s2 = inlined_call_operand.vmem [shape: f32[1,256], index: 2, kind: input, shape index: {}]   ;;  %s1042_s3 = inlined_call_operand.hbm [shape: bf16[256,128], index: 3, kind: input, shape index: {}]   ;;  %s1043_s4 = inlined_call_operand.vmem [shape: f32[1,128], index: 4, kind: input, shape index: {}]   ;;  %s1044_s5 = inlined_call_operand.hbm [shape: bf16[128,128], index: 5, kind: input, shape index: {}]   ;;  %s1045_s6 = inlined_call_operand.vmem [shape: f32[1,128], index: 6, kind: input, shape index: {}]   ;;  %s1046_s7 = inlined_call_operand.hbm [shape: f32[16,128], index: 7, kind: output, shape index: {}]  }
   0x1   :  { %13 = vsyncpa [#allocation6], 0 }
   0x2   :  { %14 = vsyncpa [#allocation9], 0 }
   0x3   :  { %15 = vsyncpa [#allocation4], 0  ;;  %s956_s24 = smov [#allocation5]  }
   0x4   :  { %s33_s25 = sshll.u32 %s956_s24, 4  ;;  %s34_s25 = int_to_ptr.vmem [resolvable:$true] %s33_s25 }
   0x5   :  { %s856_s26 = scalar_lea.vmem %s34_s25, 4096  ;;  %p861_p1 = scmp.lt.s32.totalorder %s34_s25, %s34_s25 }
   0x6   :  { %p857_p0 = scmp.ne.s32.totalorder %s34_s25, %s856_s26  ;;  %p862_p2 = scmp.lt.s32.totalorder %s856_s26, %s856_s26 }
   0x8   :  { %p863_p3 = por %p862_p2, %p861_p1 }
   0xa   :  { %p864_p4 = pnand %p863_p3, %p857_p0 }
   0xc   :  { %867 = shalt.err (!%p864_p4)
}
   0xd   :  { %s957_s27 = smov 128   ;;  %s958_s28 = smov 8  }
   0xe   :  { %39 = dma.hbm_to_vmem [thread:$0]  %s1040_s1, 4096, %s34_s25, [#allocation6], %s957_s27, %s957_s27, %s958_s28  }
   0xf   :  { %s959_s8 = smov [#allocation2]  }
  0x10   :  { %s21_s9 = sshll.u32 %s959_s8, 4  ;;  %s22_s9 = int_to_ptr.vmem [resolvable:$true] %s21_s9 }
  0x11   :  { %s876_s10 = scalar_lea.vmem %s22_s9, 512  ;;  %p881_p6 = scmp.lt.s32.totalorder %s22_s9, %s22_s9 }
  0x12   :  { %p877_p5 = scmp.ne.s32.totalorder %s22_s9, %s876_s10  ;;  %p882_p7 = scmp.lt.s32.totalorder %s876_s10, %s876_s10 }
  0x14   :  { %p883_p8 = por %p882_p7, %p881_p6 }
  0x16   :  { %p884_p9 = pnand %p883_p8, %p877_p5 }
  0x18   :  { %887 = shalt.err (!%p884_p9)
}
  0x19   :  { %s960_s11 = smov 256   ;;  %s961_s12 = smov 16  }
  0x1a   :  { %27 = dma.hbm_to_vmem [thread:$0]  %s1039_s0, 512, %s22_s9, [#allocation3], %s960_s11, %s960_s11, %s961_s12  }
  0x1b   :  { %s962_s15 = smov [#allocation7]  }
  0x1c   :  { %s47_s16 = sshll.u32 %s962_s15, 4  ;;  %s48_s16 = int_to_ptr.vmem [resolvable:$true] %s47_s16 }
  0x1d   :  { %s896_s1 = scalar_lea.vmem %s48_s16, 2048  ;;  %p901_p11 = scmp.lt.s32.totalorder %s48_s16, %s48_s16 }
  0x1e   :  { %p897_p10 = scmp.ne.s32.totalorder %s48_s16, %s896_s1  ;;  %p902_p12 = scmp.lt.s32.totalorder %s896_s1, %s896_s1 }
  0x20   :  { %p903_p13 = por %p902_p12, %p901_p11 }
  0x22   :  { %p904_p0 = pnand %p903_p13, %p897_p10 }
  0x24   :  { %907 = shalt.err (!%p904_p0)
}
  0x25   :  { %s963_s17 = smov 64   ;;  %s964_s18 = smov 4  }
  0x26   :  { %53 = dma.hbm_to_vmem [thread:$0]  %s1042_s3, 2048, %s48_s16, [#allocation6], %s963_s17, %s963_s17, %s964_s18  }
  0x27   :  { %s965_s21 = smov [#allocation8]  }
  0x28   :  { %s61_s22 = sshll.u32 %s965_s21, 4  ;;  %s62_s22 = int_to_ptr.vmem [resolvable:$true] %s61_s22 }
  0x29   :  { %s916_s0 = scalar_lea.vmem %s62_s22, 1024  ;;  %p921_p2 = scmp.lt.s32.totalorder %s62_s22, %s62_s22 }
  0x2a   :  { %p917_p1 = scmp.ne.s32.totalorder %s62_s22, %s916_s0  ;;  %p922_p3 = scmp.lt.s32.totalorder %s916_s0, %s916_s0 }
  0x2c   :  { %p923_p4 = por %p922_p3, %p921_p2 }
  0x2e   :  { %p924_p5 = pnand %p923_p4, %p917_p1 }
  0x30   :  { %927 = shalt.err (!%p924_p5)
}
  0x31   :  { %67 = dma.hbm_to_vmem [thread:$0]  %s1044_s5, 1024, %s62_s22, [#allocation9], %s963_s17, %s963_s17, %s964_s18  }
  0x32   :  { %948 = dma.done.wait [#allocation3], 512  }
  0x33   :  { %949 = vsyncadd [#allocation3], 4294966784 }
  0x34   :  { %950 = dma.done.wait [#allocation6], 6144  }
  0x35   :  { %951 = vsyncadd [#allocation6], 4294961152 }
  0x36   :  { %952 = dma.done.wait [#allocation9], 1024  }
  0x37   :  { %953 = vsyncadd [#allocation9], 4294966272  ;;  %v776_v0 = vld [vmem:[#allocation5 + $0x74] ss:$8 sps:$4 sm:$0xff]   ;;  %v778_v1 = vld [vmem:[#allocation5 + $0x70] ss:$8 sps:$4 sm:$0xff]   ;;  %v123_v55 = vlaneseq }
  0x38   :  { %293 = vmatprep.subr.bf16.mxu0 %v776_v0  ;;  %v779_v2 = vld [vmem:[#allocation5 + $0x64] ss:$8 sps:$4 sm:$0xff]   ;;  %v781_v3 = vld [vmem:[#allocation5 + $0x60] ss:$8 sps:$4 sm:$0xff]   ;;  %v782_v4 = vld [vmem:[#allocation5 + $0x54] ss:$8 sps:$4 sm:$0xff]  }
  0x39   :  { %294 = vmatpush1.bf16.msra.mxu0 %v778_v1  ;;  %v784_v5 = vld [vmem:[#allocation5 + $0x50] ss:$8 sps:$4 sm:$0xff]   ;;  %v785_v6 = vld [vmem:[#allocation5 + $0x44] ss:$8 sps:$4 sm:$0xff]   ;;  %v787_v7 = vld [vmem:[#allocation5 + $0x40] ss:$8 sps:$4 sm:$0xff]  }
  0x3a   :  { %295 = vmatprep.subr.bf16.mxu0 %v779_v2  ;;  %v788_v8 = vld [vmem:[#allocation5 + $0x34] ss:$8 sps:$4 sm:$0xff]   ;;  %v790_v9 = vld [vmem:[#allocation5 + $0x30] ss:$8 sps:$4 sm:$0xff]   ;;  %v791_v10 = vld [vmem:[#allocation5 + $0x24] ss:$8 sps:$4 sm:$0xff]  }
  0x3b   :  { %v793_v11 = vld [vmem:[#allocation5 + $0x20] ss:$8 sps:$4 sm:$0xff]   ;;  %v794_v12 = vld [vmem:[#allocation5 + $0x14] ss:$8 sps:$4 sm:$0xff]   ;;  %v796_v15 = vld [vmem:[#allocation5 + $0x10] ss:$8 sps:$4 sm:$0xff]  }
  0x3c   :  { %v84_v13 = vld [vmem:[#allocation2 + $0x8] sm:$0xff]  ;;  %v86_v14 = vld [vmem:[#allocation2 + $0x18] sm:$0xff]  ;;  %v826_v21 = vld [vmem:[#allocation7 + $0x70] sm:$0xff]   ;;  %v966_v54 = vmov 0.0   ;;  %v124_v56 = vshrl.u32 %v123_v55, 7  ;;  %vm967_vm0 = vmmov 0  }
  0x3d   :  { %296 = vmatpush1.bf16.msra.mxu0 %v781_v3  ;;  %v797_v16 = vld [vmem:[#allocation5 + $0x4] ss:$8 sps:$4 sm:$0xff]   ;;  %v121_v17 = vpack.c.bf16 %v86_v14, %v84_v13  ;;  %v824_v18 = vld [vmem:[#allocation7 + $0x78] sm:$0xff]   ;;  %v799_v20 = vld [vmem:[#allocation5] ss:$8 sps:$4 sm:$0xff]   ;;  %s968_s30 = smov [#allocation10]  }
  0x3e   :  { %297 = vmatprep.subr.bf16.mxu0 %v782_v4  ;;  %v825_v19 = vld [vmem:[#allocation7 + $0x38] sm:$0xff]   ;;  %712 = vmatprep.subr.bf16.mxu1 %v824_v18  ;;  %v827_v22 = vld [vmem:[#allocation7 + $0x30] sm:$0xff]   ;;  %v828_v23 = vld [vmem:[#allocation7 + $0x68] sm:$0xff]   ;;  %v129_v57 = vsub.s32 1, %v124_v56  ;;  %v125_v58 = vsub.s32 0, %v124_v56  ;;  %s640_s8 = sshll.u32 %s968_s30, 4  ;;  %s641_s8 = int_to_ptr.vmem [resolvable:$true] %s640_s8 }
  0x3f   :  { %325 = vmatprep.mubr.bf16.mxu0 %v121_v17  ;;  %713 = vmatpush3.bf16.msra.mxu1 %v825_v19  ;;  %v800_v24 = vld [vmem:[#allocation5 + $0xf4] ss:$8 sps:$4 sm:$0xff]   ;;  %v802_v25 = vld [vmem:[#allocation5 + $0xf0] ss:$8 sps:$4 sm:$0xff]   ;;  %v829_v26 = vld [vmem:[#allocation7 + $0x28] sm:$0xff]   ;;  %p933_p7 = scmp.lt.s32.totalorder %s641_s8, %s641_s8 }
  0x40   :  { %714 = vmatprep.subr.bf16.mxu1 %v826_v21  ;;  %v830_v27 = vld [vmem:[#allocation7 + $0x60] sm:$0xff]   ;;  %v832_v31 = vld [vmem:[#allocation7 + $0x58] sm:$0xff]   ;;  %v85_v46 = vld [vmem:[#allocation2 + $0x10] sm:$0xff] }
  0x41   :  { %298 = vmatpush1.bf16.msra.mxu0 %v784_v5  ;;  %v803_v28 = vld [vmem:[#allocation5 + $0xe4] ss:$8 sps:$4 sm:$0xff]   ;;  %v805_v30 = vld [vmem:[#allocation5 + $0xe0] ss:$8 sps:$4 sm:$0xff]   ;;  %v806_v32 = vld [vmem:[#allocation5 + $0xd4] ss:$8 sps:$4 sm:$0xff]  }
  0x42   :  { %299 = vmatprep.subr.bf16.mxu0 %v785_v6  ;;  %v831_v29 = vld [vmem:[#allocation7 + $0x20] sm:$0xff]   ;;  %v833_v33 = vld [vmem:[#allocation7 + $0x18] sm:$0xff]   ;;  %v834_v48 = vld [vmem:[#allocation7 + $0x50] sm:$0xff]  }
  0x43   :  { %715 = vmatpush3.bf16.msra.mxu1 %v827_v22  ;;  %v808_v34 = vld [vmem:[#allocation5 + $0xd0] ss:$8 sps:$4 sm:$0xff]   ;;  %v809_v35 = vld [vmem:[#allocation5 + $0xc4] ss:$8 sps:$4 sm:$0xff]   ;;  %v811_v36 = vld [vmem:[#allocation5 + $0xc0] ss:$8 sps:$4 sm:$0xff]  }
  0x44   :  { %716 = vmatprep.subr.bf16.mxu1 %v828_v23  ;;  %v812_v37 = vld [vmem:[#allocation5 + $0xb4] ss:$8 sps:$4 sm:$0xff]   ;;  %v814_v38 = vld [vmem:[#allocation5 + $0xb0] ss:$8 sps:$4 sm:$0xff]   ;;  %v815_v39 = vld [vmem:[#allocation5 + $0xa4] ss:$8 sps:$4 sm:$0xff]  }
  0x45   :  { %300 = vmatpush1.bf16.msra.mxu0 %v787_v7  ;;  %v817_v40 = vld [vmem:[#allocation5 + $0xa0] ss:$8 sps:$4 sm:$0xff]   ;;  %v818_v41 = vld [vmem:[#allocation5 + $0x94] ss:$8 sps:$4 sm:$0xff]   ;;  %v820_v42 = vld [vmem:[#allocation5 + $0x90] ss:$8 sps:$4 sm:$0xff]  }
  0x46   :  { %301 = vmatprep.subr.bf16.mxu0 %v788_v8  ;;  %v821_v43 = vld [vmem:[#allocation5 + $0x84] ss:$8 sps:$4 sm:$0xff]   ;;  %v823_v44 = vld [vmem:[#allocation5 + $0x80] ss:$8 sps:$4 sm:$0xff]   ;;  %v835_v49 = vld [vmem:[#allocation7 + $0x10] sm:$0xff]  }
  0x47   :  { %717 = vmatpush3.bf16.msra.mxu1 %v829_v26  ;;  %v83_v45 = vld [vmem:[#allocation2] sm:$0xff]  ;;  %v836_v50 = vld [vmem:[#allocation7 + $0x48] sm:$0xff]   ;;  %v841_v13 = vld [vmem:[#allocation8 + $0x30] sm:$0xff]  }
  0x48   :  { %718 = vmatprep.subr.bf16.mxu1 %v830_v27  ;;  %v120_v47 = vpack.c.bf16 %v85_v46, %v83_v45  ;;  %v837_v51 = vld [vmem:[#allocation7 + $0x8] sm:$0xff]   ;;  %v838_v52 = vld [vmem:[#allocation7 + $0x40] sm:$0xff]   ;;  %v845_v17 = vld [vmem:[#allocation8 + $0x10] sm:$0xff]  }
  0x49   :  { %302 = vmatpush1.bf16.msra.mxu0 %v790_v9  ;;  %v839_v53 = vld [vmem:[#allocation7] sm:$0xff]   ;;  %v842_v14 = vld [vmem:[#allocation8 + $0x28] sm:$0xff]  }
  0x4a   :  { %303 = vmatprep.subr.bf16.mxu0 %v791_v10  ;;  %v119_v59 = vld [vmem:[%s1041_s2] sm:$0x3]  ;;  %v846_v18 = vld [vmem:[#allocation8 + $0x8] sm:$0xff]  }
  0x4b   :  { %719 = vmatpush3.bf16.msra.mxu1 %v831_v29  ;;  %v130_v61 = vrot.slane %v119_v59, %v129_v57  ;;  %v126_v62 = vrot.slane %v119_v59, %v125_v58  ;;  %v847_v19 = vld [vmem:[#allocation8] sm:$0xff]  }
  0x4c   :  { %720 = vmatprep.subr.bf16.mxu1 %v832_v31  ;;  %v686_v23 = vld [vmem:[%s1043_s4] ss:$0 sm:$0xff]  ;;  %s928_s4 = scalar_lea.vmem %s641_s8, 256 }
  0x4d   :  { %304 = vmatpush1.bf16.msra.mxu0 %v793_v11  ;;  %v840_v11 = vld [vmem:[#allocation8 + $0x38] sm:$0xff]   ;;  %p929_p6 = scmp.ne.s32.totalorder %s641_s8, %s928_s4  ;;  %p934_p8 = scmp.lt.s32.totalorder %s928_s4, %s928_s4 }
  0x4e   :  { %305 = vmatprep.subr.bf16.mxu0 %v794_v12 }
  0x4f   :  { %721 = vmatpush3.bf16.msra.mxu1 %v833_v33  ;;  %p935_p9 = por %p934_p8, %p933_p7 }
  0x50   :  { %722 = vmatprep.subr.bf16.mxu1 %v834_v48 }
  0x51   :  { %306 = vmatpush1.bf16.msra.mxu0 %v796_v15  ;;  %v843_v15 = vld [vmem:[#allocation8 + $0x20] sm:$0xff]   ;;  %p936_p10 = pnand %p935_p9, %p929_p6 }
  0x52   :  { %307 = vmatprep.subr.bf16.mxu0 %v797_v16  ;;  %v844_v16 = vld [vmem:[#allocation8 + $0x18] sm:$0xff]  }
  0x53   :  { %723 = vmatpush3.bf16.msra.mxu1 %v835_v49 }
  0x54   :  { %724 = vmatprep.subr.bf16.mxu1 %v836_v50 }
  0x55   :  { %308 = vmatpush1.bf16.msra.mxu0 %v799_v20 }
  0x56   :  { %309 = vmatprep.subr.bf16.mxu0 %v800_v24 }
  0x57   :  { %725 = vmatpush3.bf16.msra.mxu1 %v837_v51 }
  0x58   :  { %726 = vmatprep.subr.bf16.mxu1 %v838_v52 }
  0x59   :  { %310 = vmatpush2.bf16.msra.mxu0 %v802_v25 }
  0x5a   :  { %311 = vmatprep.subr.bf16.mxu0 %v803_v28 }
  0x5b   :  { %727 = vmatpush3.bf16.msra.mxu1 %v839_v53 }
  0x5c   :  { %743 = vmatprep.subr.bf16.mxu1 %v966_v54 }
  0x5d   :  { %312 = vmatpush2.bf16.msra.mxu0 %v805_v30 }
  0x5e   :  { %313 = vmatprep.subr.bf16.mxu0 %v806_v32  ;;  %v703_v32 = vld [vmem:[%s1045_s6] ss:$0 sm:$0xff] }
  0x61   :  { %314 = vmatpush2.bf16.msra.mxu0 %v808_v34 }
  0x62   :  { %315 = vmatprep.subr.bf16.mxu0 %v809_v35 }
  0x65   :  { %316 = vmatpush2.bf16.msra.mxu0 %v811_v36 }
  0x66   :  { %317 = vmatprep.subr.bf16.mxu0 %v812_v37 }
  0x69   :  { %318 = vmatpush2.bf16.msra.mxu0 %v814_v38 }
  0x6a   :  { %319 = vmatprep.subr.bf16.mxu0 %v815_v39 }
  0x6d   :  { %320 = vmatpush2.bf16.msra.mxu0 %v817_v40 }
  0x6e   :  { %321 = vmatprep.subr.bf16.mxu0 %v818_v41 }
  0x71   :  { %322 = vmatpush2.bf16.msra.mxu0 %v820_v42 }
  0x72   :  { %323 = vmatprep.subr.bf16.mxu0 %v821_v43 }
  0x75   :  { %324 = vmatpush2.bf16.msra.mxu0 %v823_v44 }
  0x78   :  { %326 = vmatmul.mubr.bf16.vlgmr.msra.gmra.mxu0 %v120_v47 }
 0x138   :  { %v327_v60 = vpop.f32.mrf.mxu0 }
 0x139   :  { %v328_v3 = vadd.f32 %v327_v60, %v126_v62 }
 0x13a   :  { %v329_v63 = vpop.f32.mrf.mxu0 }
 0x13b   :  { %v330_v1 = vadd.f32 %v329_v63, %v130_v61  ;;  %v336_v9 = vmax.f32 %v328_v3, 0.0 }
 0x13c   :  { %v331_v0 = vpop.f32.mrf.mxu0 }
 0x13d   :  { %v332_v2 = vadd.f32 %v331_v0, %v126_v62  ;;  %v337_v7 = vmax.f32 %v330_v1, 0.0 }
 0x13e   :  { %v333_v4 = vpop.f32.mrf.mxu0 }
 0x13f   :  { %v334_v5 = vadd.f32 %v333_v4, %v130_v61  ;;  %v338_v6 = vmax.f32 %v332_v2, 0.0 }
 0x141   :  { %v339_v8 = vmax.f32 %v334_v5, 0.0  ;;  %v373_v12 = vpack.c.bf16 %v338_v6, %v336_v9 }
 0x143   :  { %v374_v10 = vpack.c.bf16 %v339_v8, %v337_v7 }
 0x145   :  { %509 = vmatprep.mubr.bf16.mxu1 %v374_v10 }
 0x146   :  { %510 = vmatmul.mubr.bf16.vlgmr.msra.gmra.mxu1 %v373_v12 }
 0x147   :  { %744 = vmatpush3.bf16.msra.mxu1 %v840_v11  ;;  %759 = vmatprep.mubr.msk.bf16.mxu1 %vm967_vm0, %v966_v54 }
 0x148   :  { %745 = vmatprep.subr.bf16.mxu1 %v966_v54 }
 0x14b   :  { %746 = vmatpush3.bf16.msra.mxu1 %v841_v13 }
 0x14c   :  { %747 = vmatprep.subr.bf16.mxu1 %v966_v54 }
 0x14f   :  { %748 = vmatpush3.bf16.msra.mxu1 %v842_v14 }
 0x150   :  { %749 = vmatprep.subr.bf16.mxu1 %v966_v54 }
 0x153   :  { %750 = vmatpush3.bf16.msra.mxu1 %v843_v15 }
 0x154   :  { %751 = vmatprep.subr.bf16.mxu1 %v966_v54 }
 0x157   :  { %752 = vmatpush3.bf16.msra.mxu1 %v844_v16 }
 0x158   :  { %753 = vmatprep.subr.bf16.mxu1 %v966_v54 }
 0x15b   :  { %754 = vmatpush3.bf16.msra.mxu1 %v845_v17 }
 0x15c   :  { %755 = vmatprep.subr.bf16.mxu1 %v966_v54 }
 0x15f   :  { %756 = vmatpush3.bf16.msra.mxu1 %v846_v18 }
 0x160   :  { %757 = vmatprep.subr.bf16.mxu1 %v966_v54 }
 0x163   :  { %758 = vmatpush3.bf16.msra.mxu1 %v847_v19 }
 0x206   :  { %v728_v20 = vpop.f32.mrf.mxu1 }
 0x208   :  { %v729_v21 = vpop.f32.mrf.mxu1 }
 0x209   :  { %v730_v22 = vadd.f32 %v729_v21, %v728_v20 }
 0x20a   :  { %v731_v24 = vpop.f32.mrf.mxu1 }
 0x20b   :  { %v512_v26 = vadd.f32 %v730_v22, %v686_v23 }
 0x20c   :  { %v732_v25 = vpop.f32.mrf.mxu1 }
 0x20d   :  { %v733_v27 = vadd.f32 %v732_v25, %v731_v24  ;;  %v518_v29 = vmax.f32 %v512_v26, 0.0 }
 0x20f   :  { %v515_v28 = vadd.f32 %v733_v27, %v686_v23 }
 0x211   :  { %v519_v30 = vmax.f32 %v515_v28, 0.0 }
 0x213   :  { %v537_v31 = vpack.c.bf16 %v519_v30, %v518_v29 }
 0x215   :  { %760 = vmatmul.mubr.bf16.vlgmr.msra.gmra.mxu1 %v537_v31 }
 0x2d5   :  { %v626_v33 = vpop.f32.mrf.mxu1 }
 0x2d6   :  { %v627_v34 = vadd.f32 %v703_v32, %v626_v33 }
 0x2d7   :  { %v761_v35 = vpop.f32.mrf.mxu1 }
 0x2d8   :  { %633 = vst [vmem:[#allocation10] sm:$0xff] %v627_v34 }
 0x2d9   :  { %v629_v36 = vpop.f32.mrf.mxu1 }
 0x2da   :  { %v630_v37 = vadd.f32 %v703_v32, %v629_v36 }
 0x2db   :  { %v762_v38 = vpop.f32.mrf.mxu1 }
 0x2dc   :  { %634 = vst [vmem:[#allocation10 + $0x8] sm:$0xff] %v630_v37 }
 0x2dd   :  { %939 = shalt.err (!%p936_p10)
}
 0x2de   :  { %646 = dma.vmem_to_hbm [thread:$0]  %s641_s8, 256, %s1046_s7, [#allocation4], %s957_s27, %s957_s27, %s958_s28  }
 0x2df   :  { %954 = dma.done.wait [#allocation4], 256  }
 0x2e0   :  { %955 = vsyncadd [#allocation4], 4294967040 }
 0x2e1   :  { %650 = vsyncpa [#allocation3], 1 }
 0x2e2   :  { %651 = vsyncpa [#allocation6], 1 }
 0x2e3   :  { %652 = vsyncpa [#allocation9], 1 }
 0x2e4   :  { %653 = vsyncpa [#allocation4], 1 }

</bundles_post_ra>
